<compile_context>
chip_gen: v6e
topology: v6e:2x2x1
jax: 0.10.0
libtpu: 0.0.40
codegen_flags: <defaults>
</compile_context>

<pallas_src>
import math
from functools import partial

import jax
import jax.numpy as jnp
from jax import lax
from jax.experimental import pallas as pl
from jax.experimental.pallas import tpu as pltpu


# --------------------------------------------------------------------------
# Pass 1: fused pre-norm + QKV projection, head-major bf16 outputs.
# --------------------------------------------------------------------------
def _qkv_kernel(x_ref,                      # (tk, D)   input tokens (batch-squeezed)
                g_ref,                      # (1, D)    RMSNorm gain
                wqkv_ref, bqkv_ref,         # (D, 3D) bf16, (1, 3D) f32 (q part pre-scaled)
                q_ref, k_ref, v_ref,        # (H, tk, hd) bf16 each
                *, n_heads, eps):
    tk, D = x_ref.shape
    H = n_heads
    hd = D // H
    f32, bf16 = jnp.float32, jnp.bfloat16

    x = x_ref[...].astype(f32)
    ms = jnp.mean(x * x, axis=-1, keepdims=True)
    xn = x * lax.rsqrt(ms + eps) * g_ref[...]

    qkv = jnp.dot(xn.astype(bf16), wqkv_ref[...],
                  preferred_element_type=f32) + bqkv_ref[...]       # (tk, 3D) f32

    def to_heads(t):                                                # (tk, D) -> (H, tk, hd)
        return t.reshape(tk, H, hd).transpose(1, 0, 2).astype(bf16)

    q_ref[...] = to_heads(qkv[:, :D])
    k_ref[...] = to_heads(qkv[:, D:2 * D])
    v_ref[...] = to_heads(qkv[:, 2 * D:])


# --------------------------------------------------------------------------
# Pass 2: flash attention over precomputed K/V + out-proj + residual + FFN.
# --------------------------------------------------------------------------
def _attn_ffn_kernel(x_ref,                 # (tq, D)      query-tile residual input
                     q_ref,                 # (H, tq, hd)  bf16, already scaled
                     k_ref, v_ref,          # (H, S, hd)   bf16, full sequence (per batch)
                     g_ff_ref,              # (1, D)
                     wo_ref, bo_ref,        # (D, D) bf16, (1, D) f32
                     w1_ref, b1_ref,        # (D, Dff) bf16, (1, Dff) f32
                     w2_ref, b2_ref,        # (Dff, D) bf16, (1, D) f32
                     o_ref,                 # (tq, D)
                     *, n_heads, eps, tq, tk, dff_chunk):
    qi = pl.program_id(1)
    _, D = x_ref.shape
    H = n_heads
    hd = D // H
    f32, bf16 = jnp.float32, jnp.bfloat16
    neg = jnp.float32(-1e30)

    x_q = x_ref[...].astype(f32)                                    # (tq, D)
    q = q_ref[...]                                                  # (H, tq, hd) bf16

    def attend(k_t, v_t, mask_fn, carry):
        m_i, l_i, acc = carry
        s = jnp.einsum('hqd,hkd->hqk', q, k_t,
                       preferred_element_type=f32)                  # (H, tq, tk) f32
        s = mask_fn(s)
        m_new = jnp.maximum(m_i, jnp.max(s, axis=-1, keepdims=True))
        alpha = jnp.exp(m_i - m_new)
        p = jnp.exp(s - m_new)
        l_new = alpha * l_i + jnp.sum(p, axis=-1, keepdims=True)
        pv = jnp.einsum('hqk,hkd->hqd', p.astype(bf16), v_t,
                        preferred_element_type=f32)                 # (H, tq, hd)
        return m_new, l_new, alpha * acc + pv

    # -------- fully-visible KV tiles (j < qi): no masking work at all ------
    def full_step(j, carry):
        ks = pl.multiple_of(j * tk, tk)
        k_t = k_ref[:, pl.ds(ks, tk), :]
        v_t = v_ref[:, pl.ds(ks, tk), :]
        return attend(k_t, v_t, lambda s: s, carry)

    m0 = jnp.full((H, tq, 1), neg, f32)
    l0 = jnp.zeros((H, tq, 1), f32)
    acc0 = jnp.zeros((H, tq, hd), f32)
    carry = lax.fori_loop(0, qi, full_step, (m0, l0, acc0))

    # -------- diagonal KV tile (j == qi): within-tile causal mask ----------
    diag = pl.multiple_of(qi * tk, tk)
    k_d = k_ref[:, pl.ds(diag, tk), :]
    v_d = v_ref[:, pl.ds(diag, tk), :]
    row = lax.broadcasted_iota(jnp.int32, (1, tq, tk), 1)
    col = lax.broadcasted_iota(jnp.int32, (1, tq, tk), 2)
    mask = col <= row
    _, l_f, acc_f = attend(k_d, v_d, lambda s: jnp.where(mask, s, neg), carry)

    attn = acc_f * pl.reciprocal(l_f, approx=True)                  # (H, tq, hd)
    attn = attn.transpose(1, 0, 2).reshape(tq, D)                   # (tq, D)
    attn_out = jnp.dot(attn.astype(bf16), wo_ref[...],
                       preferred_element_type=f32) + bo_ref[...]

    # attn_dropout is identity in eval mode
    x1 = x_q + attn_out

    # -------------------- feed-forward, chunked over Dff -------------------
    ms = jnp.mean(x1 * x1, axis=-1, keepdims=True)
    xn2 = x1 * lax.rsqrt(ms + eps) * g_ff_ref[...]
    xn2_b = xn2.astype(bf16)
    n_chunks = w1_ref.shape[1] // dff_chunk

    def ff_step(c, acc):
        lo = pl.multiple_of(c * dff_chunk, dff_chunk)
        h = jnp.dot(xn2_b, w1_ref[:, pl.ds(lo, dff_chunk)],
                    preferred_element_type=f32) + b1_ref[:, pl.ds(lo, dff_chunk)]
        h = jax.nn.gelu(h)
        return acc + jnp.dot(h.astype(bf16), w2_ref[pl.ds(lo, dff_chunk), :],
                             preferred_element_type=f32)

    ff = lax.fori_loop(0, n_chunks, ff_step, jnp.zeros((tq, D), f32))
    ff = ff + b2_ref[...]

    # ff_dropout is identity in eval mode
    o_ref[...] = (x1 + ff).astype(o_ref.dtype)


# --------------------------------------------------------------------------
# Wrappers.
# --------------------------------------------------------------------------
def _pick_seq_tile(S, max_tile=256):
    if S <= max_tile:
        return S
    for t in range(max_tile, 7, -8):
        if S % t == 0:
            return t
    return S


def _vmem_limit_bytes():
    """Generation-aware VMEM cap: ~80% of physical, capped at 100 MiB."""
    cap = 128 * 1024 * 1024
    try:
        info = pltpu.get_tpu_info()
        cap = getattr(info, "vmem_capacity_bytes", cap) or cap
    except Exception:
        pass
    return min(int(cap * 0.8), 100 * 1024 * 1024)


def prepare_params(params, *, n_heads):
    """One-time parameter prep (hoisted out of the forward path):
    fuse Q/K/V weights (attention scale folded into the Q part), cast all MXU
    operands to bf16."""
    D = params["wq"].shape[0]
    hd = D // n_heads
    scale = 1.0 / math.sqrt(hd)
    bf16, f32 = jnp.bfloat16, jnp.float32
    wqkv = jnp.concatenate(
        [params["wq"] * scale, params["wk"], params["wv"]], axis=1).astype(bf16)
    bqkv = jnp.concatenate(
        [params["bq"] * scale, params["bk"], params["bv"]], axis=1).astype(f32)
    return {
        "g_attn": params["g_attn"].astype(f32),
        "g_ff": params["g_ff"].astype(f32),
        "wqkv": wqkv, "bqkv": bqkv,
        "wo": params["wo"].astype(bf16), "bo": params["bo"].astype(f32),
        "w1": params["w1"].astype(bf16), "b1": params["b1"].astype(f32),
        "w2": params["w2"].astype(bf16), "b2": params["b2"].astype(f32),
    }


def decoder_block(x, prep, *, n_heads, eps=1e-8):
    B, S, D = x.shape
    Dff = prep["w1"].shape[1]
    H = n_heads
    assert D % H == 0
    hd = D // H

    tq = _pick_seq_tile(S)
    tk = tq
    # Causal tile-skip (full tiles j < qi, masked diagonal j == qi) requires tq == tk.
    assert tq == tk and S % tq == 0
    dff_chunk = min(Dff, 512)
    assert Dff % dff_chunk == 0

    vmem_limit = _vmem_limit_bytes()
    bf16 = jnp.bfloat16

    def full_spec(shape):
        nd = len(shape)
        return pl.BlockSpec(shape, lambda *idx, _nd=nd: (0,) * _nd)

    # ---------------- pass 1: QKV projection (once per token) --------------
    qkv_kernel = partial(_qkv_kernel, n_heads=H, eps=eps)
    q, k, v = pl.pallas_call(
        qkv_kernel,
        out_shape=[jax.ShapeDtypeStruct((B, H, S, hd), bf16)] * 3,
        grid=(B, S // tk),
        in_specs=[
            pl.BlockSpec((None, tk, D), lambda b, i: (b, i, 0)),    # x tile
            full_spec((1, D)),                                      # g_attn
            full_spec((D, 3 * D)), full_spec((1, 3 * D)),           # wqkv, bqkv
        ],
        out_specs=[pl.BlockSpec((None, H, tk, hd),
                                lambda b, i: (b, 0, i, 0))] * 3,
        compiler_params=pltpu.CompilerParams(
            dimension_semantics=("parallel", "parallel"),
            vmem_limit_bytes=vmem_limit),
    )(x, prep["g_attn"], prep["wqkv"], prep["bqkv"])

    # ---------------- pass 2: attention + out-proj + FFN -------------------
    attn_kernel = partial(_attn_ffn_kernel, n_heads=H, eps=eps,
                          tq=tq, tk=tk, dff_chunk=dff_chunk)
    return pl.pallas_call(
        attn_kernel,
        out_shape=jax.ShapeDtypeStruct((B, S, D), x.dtype),
        grid=(B, S // tq),
        in_specs=[
            pl.BlockSpec((None, tq, D), lambda b, qi: (b, qi, 0)),         # x query tile
            pl.BlockSpec((None, H, tq, hd), lambda b, qi: (b, 0, qi, 0)),  # q tile
            pl.BlockSpec((None, H, S, hd), lambda b, qi: (b, 0, 0, 0)),    # k (per-batch)
            pl.BlockSpec((None, H, S, hd), lambda b, qi: (b, 0, 0, 0)),    # v (per-batch)
            full_spec((1, D)),                                             # g_ff
            full_spec((D, D)), full_spec((1, D)),                          # wo, bo
            full_spec((D, Dff)), full_spec((1, Dff)),                      # w1, b1
            full_spec((Dff, D)), full_spec((1, D)),                        # w2, b2
        ],
        out_specs=pl.BlockSpec((None, tq, D), lambda b, qi: (b, qi, 0)),
        compiler_params=pltpu.CompilerParams(
            # B axis feeds the v7x 2-TC split evenly; the qi axis has causal
            # load imbalance (cost ~ qi+1), so keep it off the core split.
            dimension_semantics=("parallel", "arbitrary"),
            vmem_limit_bytes=vmem_limit),
    )(x, q, k, v, prep["g_ff"],
      prep["wo"], prep["bo"], prep["w1"], prep["b1"], prep["w2"], prep["b2"])


# --------------------------------------------------------------------------
# Pure-JAX reference (module-faithful math, f32) + params.
# --------------------------------------------------------------------------
def decoder_block_ref(x, params, *, n_heads, eps=1e-8):
    B, S, D = x.shape
    hd = D // n_heads
    scale = 1.0 / math.sqrt(hd)

    def rmsnorm(v, g):
        ms = jnp.mean(v * v, axis=-1, keepdims=True)
        return v * lax.rsqrt(ms + eps) * g

    x = x.astype(jnp.float32)
    xn = rmsnorm(x, params["g_attn"])
    q = xn @ params["wq"] + params["bq"]
    k = xn @ params["wk"] + params["bk"]
    v = xn @ params["wv"] + params["bv"]
    q = q.reshape(B, S, n_heads, hd).transpose(0, 2, 1, 3)
    k = k.reshape(B, S, n_heads, hd).transpose(0, 2, 1, 3)
    v = v.reshape(B, S, n_heads, hd).transpose(0, 2, 1, 3)
    s = jnp.einsum("bhqd,bhkd->bhqk", q, k) * scale
    causal = jnp.tril(jnp.ones((S, S), dtype=bool))
    s = jnp.where(causal, s, jnp.float32(-1e30))
    p = jax.nn.softmax(s, axis=-1)
    attn = jnp.einsum("bhqk,bhkd->bhqd", p, v).transpose(0, 2, 1, 3).reshape(B, S, D)
    attn_out = attn @ params["wo"] + params["bo"]
    x1 = x + attn_out
    xn2 = rmsnorm(x1, params["g_ff"])
    ff = jax.nn.gelu(xn2 @ params["w1"] + params["b1"]) @ params["w2"] + params["b2"]
    return x1 + ff


def init_params(key, d_model, d_ff):
    ks = jax.random.split(key, 8)
    sd = 0.02
    f32 = jnp.float32
    return {
        "g_attn": jnp.ones((1, d_model), f32),
        "g_ff": jnp.ones((1, d_model), f32),
        "wq": sd * jax.random.normal(ks[0], (d_model, d_model), f32),
        "bq": jnp.zeros((1, d_model), f32),
        "wk": sd * jax.random.normal(ks[1], (d_model, d_model), f32),
        "bk": jnp.zeros((1, d_model), f32),
        "wv": sd * jax.random.normal(ks[2], (d_model, d_model), f32),
        "bv": jnp.zeros((1, d_model), f32),
        "wo": sd * jax.random.normal(ks[3], (d_model, d_model), f32),
        "bo": jnp.zeros((1, d_model), f32),
        "w1": sd * jax.random.normal(ks[4], (d_model, d_ff), f32),
        "b1": jnp.zeros((1, d_ff), f32),
        "w2": sd * jax.random.normal(ks[5], (d_ff, d_model), f32),
        "b2": jnp.zeros((1, d_model), f32),
    }


if __name__ == "__main__":
    B, S, D = 2, 8, 32       # batch, seq_len, d_model
    H = 4                    # n_heads (head_dim = 8)
    DFF = 4 * D              # FFN hidden
    EPS = 1e-8               # base_config.adam_epsilon

    key = jax.random.PRNGKey(0)
    kx, kp = jax.random.split(key)
    x = jax.random.normal(kx, (B, S, D), jnp.float32)
    params = init_params(kp, D, DFF)
    prep = prepare_params(params, n_heads=H)   # one-time weight prep (bf16 + fusion)

    out = decoder_block(x, prep, n_heads=H, eps=EPS)
    out = jax.block_until_ready(out)

    ref = decoder_block_ref(x, params, n_heads=H, eps=EPS)
    assert out.shape == (B, S, D)
    # Tolerance covers bf16 MXU operands + approx reciprocal vs full-f32 reference.
    assert jnp.allclose(out, ref, atol=1e-2, rtol=1e-2), "mismatch vs reference"

    print("KERNEL_OK")
</pallas_src>

<mosaic_0001>
module attributes {stable_mosaic.version = 11 : i64} {
  func.func @_qkv_kernel(%arg0: i32, %arg1: i32, %arg2: memref<1x8x32xf32, #tpu.memory_space<vmem>>, %arg3: memref<1x32xf32, #tpu.memory_space<vmem>>, %arg4: memref<32x96xbf16, #tpu.memory_space<vmem>>, %arg5: memref<1x96xf32, #tpu.memory_space<vmem>>, %arg6: memref<1x4x8x8xbf16, #tpu.memory_space<vmem>>, %arg7: memref<1x4x8x8xbf16, #tpu.memory_space<vmem>>, %arg8: memref<1x4x8x8xbf16, #tpu.memory_space<vmem>>) attributes {dimension_semantics = [#tpu.dimension_semantics<parallel>, #tpu.dimension_semantics<parallel>], iteration_bounds = array<i64: 2, 1>, scalar_prefetch = 0 : i64, scratch_operands = 0 : i64, tpu.core_type = #tpu.core_type<tc>, window_params = [{transform_indices = @transform_0, window_bounds = array<i64: 1, 8, 32>}, {pipeline_mode = #tpu.pipeline_mode<synchronous>, transform_indices = @transform_1, window_bounds = array<i64: 1, 32>}, {pipeline_mode = #tpu.pipeline_mode<synchronous>, transform_indices = @transform_2, window_bounds = array<i64: 32, 96>}, {pipeline_mode = #tpu.pipeline_mode<synchronous>, transform_indices = @transform_3, window_bounds = array<i64: 1, 96>}, {transform_indices = @transform_4, window_bounds = array<i64: 1, 4, 8, 8>}, {transform_indices = @transform_5, window_bounds = array<i64: 1, 4, 8, 8>}, {transform_indices = @transform_6, window_bounds = array<i64: 1, 4, 8, 8>}]} {
    %c0 = arith.constant 0 : index
    %c0_0 = arith.constant 0 : index
    %c0_1 = arith.constant 0 : index
    %0 = vector.load %arg2[%c0, %c0_0, %c0_1] : memref<1x8x32xf32, #tpu.memory_space<vmem>>, vector<1x8x32xf32>
    %1 = vector.shape_cast %0 : vector<1x8x32xf32> to vector<8x32xf32>
    %2 = arith.mulf %1, %1 : vector<8x32xf32>
    %cst = arith.constant dense<0.000000e+00> : vector<8xf32>
    %3 = vector.multi_reduction <add>, %2, %cst [1] : vector<8x32xf32> to vector<8xf32>
    %4 = vector.shape_cast %3 : vector<8xf32> to vector<8x1xf32>
    %cst_2 = arith.constant 3.200000e+01 : f32
    %5 = vector.broadcast %cst_2 : f32 to vector<8x1xf32>
    %6 = arith.divf %4, %5 : vector<8x1xf32>
    %cst_3 = arith.constant 9.99999993E-9 : f32
    %7 = vector.broadcast %cst_3 : f32 to vector<8x1xf32>
    %8 = arith.addf %6, %7 : vector<8x1xf32>
    %9 = math.rsqrt %8 : vector<8x1xf32>
    %10 = vector.broadcast %9 : vector<8x1xf32> to vector<8x32xf32>
    %11 = arith.mulf %1, %10 : vector<8x32xf32>
    %c0_4 = arith.constant 0 : index
    %c0_5 = arith.constant 0 : index
    %12 = vector.load %arg3[%c0_4, %c0_5] : memref<1x32xf32, #tpu.memory_space<vmem>>, vector<1x32xf32>
    %13 = vector.broadcast %12 : vector<1x32xf32> to vector<8x32xf32>
    %14 = arith.mulf %11, %13 : vector<8x32xf32>
    %15 = arith.truncf %14 : vector<8x32xf32> to vector<8x32xbf16>
    %c0_6 = arith.constant 0 : index
    %c0_7 = arith.constant 0 : index
    %16 = vector.load %arg4[%c0_6, %c0_7] : memref<32x96xbf16, #tpu.memory_space<vmem>>, vector<32x96xbf16>
    %cst_8 = arith.constant dense<0.000000e+00> : vector<8x96xf32>
    %17 = tpu.matmul %15, %16, %cst_8 {dimension_numbers = #tpu.dot_dimension_numbers<[1], [0], [0], [1], [0, 0, 1, 1], [], []>} : vector<8x32xbf16>, vector<32x96xbf16>, vector<8x96xf32> -> vector<8x96xf32>
    %c0_9 = arith.constant 0 : index
    %c0_10 = arith.constant 0 : index
    %18 = vector.load %arg5[%c0_9, %c0_10] : memref<1x96xf32, #tpu.memory_space<vmem>>, vector<1x96xf32>
    %19 = vector.broadcast %18 : vector<1x96xf32> to vector<8x96xf32>
    %20 = arith.addf %17, %19 : vector<8x96xf32>
    %21 = vector.extract_strided_slice %20 {offsets = [0, 0], sizes = [8, 32], strides = [1, 1]} : vector<8x96xf32> to vector<8x32xf32>
    %22 = vector.shape_cast %21 : vector<8x32xf32> to vector<8x4x8xf32>
    %23 = tpu.transpose %22, [1, 0, 2] : vector<8x4x8xf32> -> vector<4x8x8xf32>
    %24 = arith.truncf %23 : vector<4x8x8xf32> to vector<4x8x8xbf16>
    %c0_11 = arith.constant 0 : index
    %c0_12 = arith.constant 0 : index
    %c0_13 = arith.constant 0 : index
    %c0_14 = arith.constant 0 : index
    %25 = vector.load %arg6[%c0_11, %c0_12, %c0_13, %c0_14] : memref<1x4x8x8xbf16, #tpu.memory_space<vmem>>, vector<1x4x8x8xbf16>
    %26 = vector.shape_cast %25 : vector<1x4x8x8xbf16> to vector<4x8x8xbf16>
    %27 = vector.shape_cast %24 : vector<4x8x8xbf16> to vector<1x4x8x8xbf16>
    tpu.vector_store %arg6[%c0_11, %c0_12, %c0_13, %c0_14], %27 {strides = array<i32>} : memref<1x4x8x8xbf16, #tpu.memory_space<vmem>>, vector<1x4x8x8xbf16>,
    %28 = vector.extract_strided_slice %20 {offsets = [0, 32], sizes = [8, 32], strides = [1, 1]} : vector<8x96xf32> to vector<8x32xf32>
    %29 = vector.shape_cast %28 : vector<8x32xf32> to vector<8x4x8xf32>
    %30 = tpu.transpose %29, [1, 0, 2] : vector<8x4x8xf32> -> vector<4x8x8xf32>
    %31 = arith.truncf %30 : vector<4x8x8xf32> to vector<4x8x8xbf16>
    %c0_15 = arith.constant 0 : index
    %c0_16 = arith.constant 0 : index
    %c0_17 = arith.constant 0 : index
    %c0_18 = arith.constant 0 : index
    %32 = vector.load %arg7[%c0_15, %c0_16, %c0_17, %c0_18] : memref<1x4x8x8xbf16, #tpu.memory_space<vmem>>, vector<1x4x8x8xbf16>
    %33 = vector.shape_cast %32 : vector<1x4x8x8xbf16> to vector<4x8x8xbf16>
    %34 = vector.shape_cast %31 : vector<4x8x8xbf16> to vector<1x4x8x8xbf16>
    tpu.vector_store %arg7[%c0_15, %c0_16, %c0_17, %c0_18], %34 {strides = array<i32>} : memref<1x4x8x8xbf16, #tpu.memory_space<vmem>>, vector<1x4x8x8xbf16>,
    %35 = vector.extract_strided_slice %20 {offsets = [0, 64], sizes = [8, 32], strides = [1, 1]} : vector<8x96xf32> to vector<8x32xf32>
    %36 = vector.shape_cast %35 : vector<8x32xf32> to vector<8x4x8xf32>
    %37 = tpu.transpose %36, [1, 0, 2] : vector<8x4x8xf32> -> vector<4x8x8xf32>
    %38 = arith.truncf %37 : vector<4x8x8xf32> to vector<4x8x8xbf16>
    %c0_19 = arith.constant 0 : index
    %c0_20 = arith.constant 0 : index
    %c0_21 = arith.constant 0 : index
    %c0_22 = arith.constant 0 : index
    %39 = vector.load %arg8[%c0_19, %c0_20, %c0_21, %c0_22] : memref<1x4x8x8xbf16, #tpu.memory_space<vmem>>, vector<1x4x8x8xbf16>
    %40 = vector.shape_cast %39 : vector<1x4x8x8xbf16> to vector<4x8x8xbf16>
    %41 = vector.shape_cast %38 : vector<4x8x8xbf16> to vector<1x4x8x8xbf16>
    tpu.vector_store %arg8[%c0_19, %c0_20, %c0_21, %c0_22], %41 {strides = array<i32>} : memref<1x4x8x8xbf16, #tpu.memory_space<vmem>>, vector<1x4x8x8xbf16>,
    return
  }
  func.func @transform_0(%arg0: i32, %arg1: i32) -> (i32, i32, i32) {
    %c0_i32 = arith.constant 0 : i32
    %c0_i32_0 = arith.constant 0 : i32
    return %arg0, %arg1, %c0_i32 : i32, i32, i32
  }
  func.func @transform_1(%arg0: i32, %arg1: i32) -> (i32, i32) {
    %c0_i32 = arith.constant 0 : i32
    %c0_i32_0 = arith.constant 0 : i32
    %c0_i32_1 = arith.constant 0 : i32
    return %c0_i32, %c0_i32_0 : i32, i32
  }
  func.func @transform_2(%arg0: i32, %arg1: i32) -> (i32, i32) {
    %c0_i32 = arith.constant 0 : i32
    %c0_i32_0 = arith.constant 0 : i32
    %c0_i32_1 = arith.constant 0 : i32
    return %c0_i32, %c0_i32_0 : i32, i32
  }
  func.func @transform_3(%arg0: i32, %arg1: i32) -> (i32, i32) {
    %c0_i32 = arith.constant 0 : i32
    %c0_i32_0 = arith.constant 0 : i32
    %c0_i32_1 = arith.constant 0 : i32
    return %c0_i32, %c0_i32_0 : i32, i32
  }
  func.func @transform_4(%arg0: i32, %arg1: i32) -> (i32, i32, i32, i32) {
    %c0_i32 = arith.constant 0 : i32
    %c0_i32_0 = arith.constant 0 : i32
    %c0_i32_1 = arith.constant 0 : i32
    return %arg0, %c0_i32, %arg1, %c0_i32_0 : i32, i32, i32, i32
  }
  func.func @transform_5(%arg0: i32, %arg1: i32) -> (i32, i32, i32, i32) {
    %c0_i32 = arith.constant 0 : i32
    %c0_i32_0 = arith.constant 0 : i32
    %c0_i32_1 = arith.constant 0 : i32
    return %arg0, %c0_i32, %arg1, %c0_i32_0 : i32, i32, i32, i32
  }
  func.func @transform_6(%arg0: i32, %arg1: i32) -> (i32, i32, i32, i32) {
    %c0_i32 = arith.constant 0 : i32
    %c0_i32_0 = arith.constant 0 : i32
    %c0_i32_1 = arith.constant 0 : i32
    return %arg0, %c0_i32, %arg1, %c0_i32_0 : i32, i32, i32, i32
  }
}

</mosaic_0001>

<bundles_post_ra>
// kernel: tpu_custom_call.1
= control target key start
LH: loop header
LB: loop body
LE: loop exit
PB: predicated region body
PF: predicated region fallthrough
CT: control target
= control target key end

     0   :  { %s1840_s0 = inlined_call_operand.hbm [shape: f32[2,8,32], index: 0, kind: input, shape index: {}]   ;;  %s1841_s1 = inlined_call_operand.vmem [shape: f32[1,32], index: 1, kind: input, shape index: {}]   ;;  %s1842_s2 = inlined_call_operand.hbm [shape: bf16[32,96], index: 2, kind: input, shape index: {}]   ;;  %s1843_s3 = inlined_call_operand.vmem [shape: f32[1,96], index: 3, kind: input, shape index: {}]   ;;  %s1844_s4 = inlined_call_operand.hbm [shape: bf16[2,4,8,8], index: 4, kind: output, shape index: {0}]   ;;  %s1845_s5 = inlined_call_operand.hbm [shape: bf16[2,4,8,8], index: 5, kind: output, shape index: {1}]   ;;  %s1846_s6 = inlined_call_operand.hbm [shape: bf16[2,4,8,8], index: 6, kind: output, shape index: {2}]  }
   0x1   :  { %1851 = sst [smem:[#allocation17_spill]] %s1842_s2 }
   0x2   :  { %12 = vsyncpa [#allocation3], 0 }
   0x3   :  { %14 = vsyncpa [#allocation3 + $0x1], 0 }
   0x4   :  { %15 = vsyncpa [#allocation6], 0 }
   0x5   :  { %16 = vsyncpa [#allocation4], 0 }
   0x6   :  { %18 = vsyncpa [#allocation4 + $0x1], 0 }
   0x7   :  { %19 = vsyncpa [#allocation9], 0 }
   0x8   :  { %21 = vsyncpa [#allocation9 + $0x1], 0  ;;  %s1489_s21 = smov 0   ;;  %s1491_s22 = smov 0  }
   0x9   :  { %s1493_s23 = smov 0   ;;  %s1495_s24 = smov 0  }
   0xa   :  { %s1497_s25 = smov 0   ;;  %s1499_s26 = smov 0  }
   0xb LB: > { %1852 = sst [smem:[#allocation15_spill]] %s1431_s25  ;;  %s1520_s27 = sadd.s32 4294967295, %s1435_s26   ;;  %s1435_s26 = sphi %s1499_s26, %s27_s26   ;;  %s1431_s25 = sphi %s1497_s25, %s1869_s25   ;;  %s1427_s24 = sphi %s1495_s24, %s1868_s24   ;;  %s1423_s23 = sphi %s1493_s23, %s1872_s23   ;;  %s1419_s22 = sphi %s1491_s22, %s1871_s22   ;;  %s1415_s21 = sphi %s1489_s21, %s1870_s21  }
   0xc   : > { %s1847_s28 = sadd.s32 4294967294, %s1435_s26   ;;  %p61_p0 = scmp.ne.s32.totalorder %s1419_s22, %s1415_s21 }
   0xd   : > { %p1850_p1 = scmp.eq.s32.totalorder %s1520_s27, 0  ;;  %p156_p3 = scmp.eq.s32.totalorder %s1847_s28, 1 }
   0xe   : > { %p1095_p5 = scmp.ge.s32.totalorder %s1435_s26, 1  ;;  %p219_p7 = scmp.lt.s32.totalorder %s1435_s26, 3 }
   0xf   : > { %p1531_p4 = por %p1850_p1, %p61_p0  ;;  %p1536_p6 = por %p156_p3, %p61_p0 }
  0x10   : > { %p1541_p8 = pnand %p1095_p5, %p219_p7  ;;  %s1437_s8 = smov [#allocation5]  }
  0x11   : > { %s1854_s30 = scalar_select %p1536_p6, 1, 0 }
  0x12   : > { %s234_s9 = sshll.u32 %s1437_s8, 4  ;;  %p1154_p9 = pneg %p1541_p8  ;;  %s235_s9 = int_to_ptr.vmem [resolvable:$true] %s234_s9 }
  0x13   : > { %s39_s11 = sadd.s32 1, %s1431_s25  ;;  %s1252_s12 = scalar_lea.vmem %s235_s9, 256 }
  0x14   : > { %p1550_p11 = pnand %p1154_p9, %p1850_p1  ;;  %p1253_p13 = scmp.ne.s32.totalorder %s235_s9, %s1252_s12 }
  0x15   : > { %p1260_p5 = scmp.lt.s32.totalorder %s235_s9, %s235_s9  ;;  %p1261_p7 = scmp.lt.s32.totalorder %s1252_s12, %s1252_s12 }
  0x16   : > { %p1243_p12 = pneg %p1550_p11 }
  0x17   : > { %p1262_p2 = por %p1261_p7, %p1260_p5 }
  0x18   : > { %p1255_p0 = pnand %p1253_p13, %p1243_p12 }
  0x1a   : > { %p1256_p3 = pneg %p1255_p0 }
  0x1c   : > { %p1263_p6 = pnand %p1262_p2, %p1256_p3 }
  0x1e   : > { %1266 = shalt.err (!%p1263_p6)
}
  0x1f   : > { %s1438_s13 = smov 64   ;;  %s1439_s14 = smov 4  }
  0x20   : > { %s1857_s2 = sld [smem:[#allocation17_spill]]  ;;  %p41_p2 = scmp.ge.s32.totalorder %s39_s11, 2 }
  0x21   : > { %s48_s17 = sadd.s32 1, %s1423_s23  ;;  %p55_p6 = scmp.ne.s32.totalorder %s1423_s23, %s1419_s22 }
  0x22   : > { %p56_p9 = scmp.eq.s32.totalorder %s1435_s26, 0  ;;  %s1874_s11 = smov (%p41_p2, %s39_s11), 0 }
  0x23   : > { %1858 = sst [smem:[#allocation16_spill]] %s1874_s11  ;;  %p1860_p13 = scmp.eq.s32.totalorder %s1520_s27, 1 }
  0x24   : > { %p1568_p12 = por %p56_p9, %p55_p6  ;;  %s43_s20 = ssub.s32 %s1431_s25, %s1874_s11 }
  0x25   : > { %p1574_p0 = por %p1860_p13, %p55_p6  ;;  %p1173_p3 = scmp.lt.s32.totalorder %s1435_s26, 2 }
  0x26   : > { %1157 = dma.hbm_to_vmem [thread:$0]  (!%p1550_p11), %s1857_s2, 256, %s235_s9, [#allocation6], %s1438_s13, %s1438_s13, %s1439_s14  }
  0x27   : > { %p46_p11 = scmp.eq.s32.totalorder %s43_s20, 0  ;;  %s251_s8 = sand.u32 1, %s1423_s23  }
  0x28   : > { %s1098_s9 = sshll.u32 %s251_s8, 3  ;;  %s1099_s12 = sshll.u32 %s1431_s25, 7 }
  0x29   : > { %s1583_s10 = scalar_select %p46_p11, %s1423_s23, %s48_s17  }
  0x2a   : > { %s261_s15 = scalar_lea.hbm %s1840_s0, %s1099_s12  ;;  %s255_s16 = scalar_lea.vmem [#allocation2], %s1098_s9 }
  0x2b   : > { %s263_s28 = sshll.u32 %s255_s16, 4  ;;  %p1591_p5 = pnand %p1173_p3, %p1568_p12  ;;  %s264_s28 = int_to_ptr.vmem [resolvable:$true] %s263_s28 }
  0x2c   : > { %s252_s11 = scalar_lea.sflag [#allocation3], %s251_s8  ;;  %s1280_s20 = scalar_lea.vmem %s264_s28, 128 }
  0x2d   : > { %p1269_p7 = pneg %p1591_p5  ;;  %p1281_p2 = scmp.ne.s32.totalorder %s264_s28, %s1280_s20 }
  0x2e   : > { %s1440_s17 = smov [#allocation2]  }
  0x2f   : > { %p1283_p6 = pnand %p1281_p2, %p1269_p7  ;;  %s1285_s25 = sshll.u32 %s1440_s17, 4  ;;  %s1286_s25 = int_to_ptr.vmem [resolvable:$false] %s1285_s25 }
  0x30   : > { %s1287_s12 = scalar_lea.vmem %s1286_s25, 256  ;;  %p1288_p13 = scmp.lt.s32.totalorder %s264_s28, %s1286_s25 }
  0x31   : > { %p1284_p9 = pneg %p1283_p6  ;;  %p1289_p11 = scmp.lt.s32.totalorder %s1287_s12, %s1280_s20 }
  0x33   : > { %p1290_p10 = por %p1289_p11, %p1288_p13 }
  0x35   : > { %p1291_p1 = pnand %p1290_p10, %p1284_p9 }
  0x37   : > { %1294 = shalt.err (!%p1291_p1)
}
  0x38   : > { %1161 = dma.hbm_to_vmem [thread:$0]  (!%p1591_p5), %s261_s15, 128, %s264_s28, %s252_s11  }
  0x39   : > { %272 = sbr.rel (%p1541_p8) target bundleno = 722 (0x2d2), region = 36  ;;  %s1602_s18 = sand.u32 (!%p1541_p8), 1, %s1419_s22  }
  0x3a   : > { %s1101_s8 = sshll.u32 (!%p1541_p8), %s1602_s18, 3  ;;  %s275_s9 = scalar_lea.sflag (!%p1541_p8), [#allocation3], %s1602_s18 }
  0x3b   : > { %s278_s13 = scalar_lea.vmem (!%p1541_p8), [#allocation2], %s1101_s8 }
  0x3e   : > { %1398 = dma.done.wait (%p1531_p4), %s275_s9, 128  }
  0x3f   : > { %1400 = vsyncadd (%p1531_p4), %s275_s9, 4294967168  ;;  %p1863_p1 = scmp.eq.s32.totalorder %s1520_s27, 0 }
  0x41   : > { %1402 = dma.done.wait (%p1863_p1), [#allocation6], 256   ;;  %p1864_p10 = pmov %p1863_p1 }
  0x42   : > { %v322_v0 = vld [vmem:[%s278_s13] sm:$0xff]  ;;  %vm324_vm0 = vcmask 261120   ;;  %v1237_v3 = vld [vmem:[#allocation5 + $0x8] sm:$0xff]   ;;  %v1441_v4 = vmov 0.0   ;;  %vm1442_vm1 = vmmov 0   ;;  %v1238_v5 = vld [vmem:[#allocation5] sm:$0xff]   ;;  %v423_v22 = vlaneseq }
  0x43   : > { %1404 = vsyncadd (%p1864_p10), [#allocation6], 4294967040  ;;  %v323_v1 = vmul.f32 %v322_v0, %v322_v0  ;;  %1134 = vmatprep.subr.bf16.mxu0 %v1441_v4  ;;  %1138 = vmatprep.mubr.msk.bf16.mxu0 %vm1442_vm1, %v1441_v4  ;;  %v1106_v10 = vld [vmem:[%s1841_s1] ss:$0 sm:$0xff]  ;;  %s1443_s7 = smov 112   ;;  %s1444_s11 = smov 120  }
  0x44   : > { %1135 = vmatpush3.bf16.msra.mxu0 %v1237_v3  ;;  %v1107_v14 = vld [vmem:[%s1843_s3] ss:$0 sm:$0xff]  ;;  %s1445_s14 = smov 104   ;;  %s1446_s15 = smov 96   ;;  %v1448_v20 = vmov 1983009808  }
  0x45   : > { %v325_v2 = vsel %vm324_vm0, %v323_v1, 0.0  ;;  %1136 = vmatprep.subr.bf16.mxu0 %v1441_v4  ;;  %s1447_s16 = smov 64   ;;  %v421_v21 = vunpack.c.l.s4 %v1448_v20  ;;  %v1449_v23 = vmov 1934713408   ;;  %v424_v26 = vshrl.u32 %v423_v22, 7  ;;  %s1651_s20 = sshll.u32 %s1602_s18, 4 }
  0x46   : > { %326 = vadd.xlane.f32.xlu0 %v325_v2  ;;  %v453_v24 = vunpack.c.l.s4 %v1449_v23  ;;  %s1654_s17 = sshll.u32 %s1427_s24, 8  ;;  %vm558_vm2 = vcmask 60416   ;;  %s306_s13 = scalar_lea.vmem [#allocation7], %s1651_s20 }
  0x47   : > { %v422_v25 = vunpack.c.0.s8 %v421_v21  ;;  %s1660_s9 = scalar_lea.hbm %s1844_s4, %s1654_s17  ;;  %s900_s24 = sshll.u32 %s306_s13, 4  ;;  %s1667_s24 = int_to_ptr.vmem [resolvable:$true] %s900_s24 }
  0x48   : > { %1137 = vmatpush3.bf16.msra.mxu0 %v1238_v5  ;;  %v454_v29 = vunpack.c.0.s8 %v453_v24  ;;  %s876_s2 = scalar_lea.sflag [#allocation4], %s1602_s18  ;;  %s1295_s25 = scalar_lea.vmem %s1667_s24, 256 }
  0x49   : > { %v1626_v30 = vsub.s32 %v422_v25, %v424_v26  ;;  %p1296_p4 = scmp.ne.s32.totalorder %s1667_s24, %s1295_s25  ;;  %s1450_s28 = smov [#allocation7]  }
  0x4a   : > { %v1630_v36 = vsub.s32 %v454_v29, %v424_v26  ;;  %s1299_s29 = sshll.u32 %s1450_s28, 4  ;;  %s1300_s29 = int_to_ptr.vmem [resolvable:$false] %s1299_s29 }
  0x4b   : > { %p1297_p8 = pnand %p1296_p4, %p1574_p0  ;;  %p1302_p3 = scmp.lt.s32.totalorder %s1667_s24, %s1300_s29 }
  0x4d   : > { %p1298_p12 = pneg %p1297_p8 }
  0xcf   : > { %v327_v6 = vpop.xlane.xlu0 %326 }
  0xd0   : > { %v329_v7 = vmul.f32 0.03125, %v327_v6 }
  0xd2   : > { %v330_v8 = vadd.f32 1e-08, %v329_v7 }
  0xd4   : > { %1239 = vrsqrt.f32 %v330_v8 }
  0xe1   : > { %v1240_v9 = vpop.eup %1239 }
  0xe2   : > { %v332_v11 = vmul.f32 %v1240_v9, %v322_v0 }
  0xe4   : > { %v340_v12 = vmul.f32 %v1106_v10, %v332_v11 }
  0xe6   : > { %v341_v13 = vpack.c.bf16 %v340_v12, %v340_v12 }
  0xe8   : > { %1139 = vmatmul.mubr.msk.bf16.vlgmr.msra.gmra.mxu0 %vm324_vm0, %v341_v13 }
 0x1a8   : > { %v402_v15 = vpop.f32.mrf.mxu0 }
 0x1a9   : > { %v403_v16 = vadd.f32 %v1107_v14, %v402_v15 }
 0x1aa   : > { %v1140_v17 = vpop.f32.mrf.mxu0 }
 0x1ab   : > { %412 = vrot.lane.b32.xlu1 %v403_v16, %s1443_s7  ;;  %409 = vrot.lane.b32.xlu0 %v403_v16, %s1444_s11  ;;  %s1301_s7 = scalar_lea.vmem %s1300_s29, 512 }
 0x1ac   : > { %v405_v18 = vpop.f32.mrf.mxu0  ;;  %p1303_p5 = scmp.lt.s32.totalorder %s1301_s7, %s1295_s25 }
 0x1ae   : > { %v1141_v19 = vpop.f32.mrf.mxu0  ;;  %p1304_p7 = por %p1303_p5, %p1302_p3 }
 0x1af   : > { %415 = vrot.lane.b32.xlu1 %v403_v16, %s1445_s14 }
 0x1b0   : > { %p1305_p2 = pnand %p1304_p7, %p1298_p12 }
 0x1b3   : > { %563 = vrot.lane.b32.xlu1 %v403_v16, %s1446_s15 }
 0x1b7   : > { %719 = vrot.lane.b32.xlu1 %v403_v16, %s1447_s16 }
 0x21d   : > { %v413_v27 = vpop.permute.xlu1 %412  ;;  %v410_v28 = vpop.permute.xlu0 %409 }
 0x21e   : > { %721 = vrot.lane.b32.xlu0 %v410_v28, %s1447_s16  ;;  %565 = vrot.lane.b32.xlu1 %v410_v28, %s1446_s15  ;;  %v418_v31 = vcombine.low %v403_v16, %v413_v27  ;;  %v419_v32 = vcombine.high %v403_v16, %v413_v27 }
 0x220   : > { %v426_v37 = vrot.slane %v418_v31, %v1626_v30  ;;  %v433_v38 = vrot.slane %v419_v32, %v1626_v30 }
 0x221   : > { %v416_v33 = vpop.permute.xlu1 %415 }
 0x222   : > { %v434_v34 = vcombine.low %v410_v28, %v416_v33  ;;  %v435_v35 = vcombine.high %v410_v28, %v416_v33  ;;  %725 = vrot.lane.b32.xlu0 %v416_v33, %s1447_s16  ;;  %567 = vrot.lane.b32.xlu1 %v413_v27, %s1446_s15 }
 0x224   : > { %v442_v39 = vrot.slane %v434_v34, %v1626_v30  ;;  %v449_v40 = vrot.slane %v435_v35, %v1626_v30 }
 0x226   : > { %v450_v41 = vcombine.low %v426_v37, %v442_v39  ;;  %v451_v42 = vcombine.high %v426_v37, %v442_v39  ;;  %v466_v43 = vcombine.low %v433_v38, %v449_v40  ;;  %v467_v44 = vcombine.high %v433_v38, %v449_v40  ;;  %569 = vrot.lane.b32.xlu1 %v416_v33, %s1446_s15 }
 0x228   : > { %v458_v45 = vrot.slane %v450_v41, %v1630_v36  ;;  %v465_v46 = vrot.slane %v451_v42, %v1630_v36  ;;  %v474_v47 = vrot.slane %v466_v43, %v1630_v36  ;;  %v481_v48 = vrot.slane %v467_v44, %v1630_v36 }
 0x22a   : > { %v486_v49 = vcombine.low %v458_v45, %v465_v46  ;;  %v1111_v50 = vcombine.high %v458_v45, %v465_v46  ;;  %v502_v51 = vcombine.low %v474_v47, %v481_v48  ;;  %v1112_v52 = vcombine.high %v474_v47, %v481_v48  ;;  %723 = vrot.lane.b32.xlu1 %v413_v27, %s1447_s16 }
 0x22c   : > { %v493_v53 = vrot.slane %v486_v49, %v1626_v30  ;;  %v501_v54 = vrot.slane %v1111_v50, %v1626_v30  ;;  %v509_v55 = vrot.slane %v502_v51, %v1626_v30  ;;  %v517_v56 = vrot.slane %v1112_v52, %v1626_v30 }
 0x22e   : > { %v518_v57 = vcombine.low %v493_v53, %v501_v54  ;;  %v519_v58 = vcombine.high %v493_v53, %v501_v54  ;;  %v534_v59 = vcombine.low %v509_v55, %v517_v56  ;;  %v535_v60 = vcombine.high %v509_v55, %v517_v56 }
 0x230   : > { %v526_v61 = vrot.slane %v518_v57, %v1630_v36  ;;  %v533_v62 = vrot.slane %v519_v58, %v1630_v36  ;;  %v542_v63 = vrot.slane %v534_v59, %v1630_v36  ;;  %v549_v0 = vrot.slane %v535_v60, %v1630_v36 }
 0x232   : > { %v550_v1 = vcombine.low %v526_v61, %v542_v63  ;;  %v551_v2 = vcombine.high %v526_v61, %v542_v63  ;;  %v552_v3 = vcombine.low %v533_v62, %v549_v0  ;;  %v553_v4 = vcombine.high %v533_v62, %v549_v0 }
 0x234   : > { %v554_v5 = vpack.c.bf16 %v550_v1, %v550_v1  ;;  %v555_v6 = vpack.c.bf16 %v551_v2, %v551_v2  ;;  %v556_v7 = vpack.c.bf16 %v552_v3, %v552_v3  ;;  %v557_v8 = vpack.c.bf16 %v553_v4, %v553_v4 }
 0x236   : > { %559 = vst.msk [vmem:[%s306_s13] sm:$0xf] %vm558_vm2, %v554_v5  ;;  %560 = vst.msk [vmem:[%s306_s13 + $0x4] sm:$0xf] %vm558_vm2, %v555_v6 }
 0x237   : > { %561 = vst.msk [vmem:[%s306_s13 + $0x8] sm:$0xf] %vm558_vm2, %v556_v7  ;;  %562 = vst.msk [vmem:[%s306_s13 + $0xc] sm:$0xf] %vm558_vm2, %v557_v8 }
 0x238   : > { %1308 = shalt.err (!%p1305_p2)
}
 0x239   : > { %s1309_s11 = scalar_lea.hbm %s1660_s9, 256  ;;  %s1313_s12 = scalar_lea.hbm %s1844_s4, 512 }
 0x23a   : > { %p1310_p6 = scmp.ne.s32.totalorder %s1660_s9, %s1309_s11  ;;  %p1314_p11 = scmp.lt.s32.totalorder %s1660_s9, %s1844_s4 }
 0x23b   : > { %p1315_p1 = scmp.lt.s32.totalorder %s1313_s12, %s1309_s11 }
 0x23c   : > { %p1311_p9 = pnand %p1310_p6, %p1574_p0 }
 0x23d   : > { %p1316_p10 = por %p1315_p1, %p1314_p11 }
 0x23e   : > { %p1312_p13 = pneg %p1311_p9 }
 0x240   : > { %p1317_p4 = pnand %p1316_p10, %p1312_p13 }
 0x242   : > { %1320 = shalt.err (!%p1317_p4)
}
 0x243   : > { %s1451_s25 = smov 4   ;;  %v564_v9 = vpop.permute.xlu1 %563  ;;  %s880_s18 = sand.u32 1, %s1520_s27  }
 0x244   : > { %1148 = dma.vmem_to_hbm [thread:$0]  (%p1574_p0), %s1667_s24, 256, %s1660_s9, %s876_s2, %s1447_s16, %s1447_s16, %s1451_s25  }
 0x245   : > { %s313_s9 = scalar_lea.vmem [#allocation8], %s1651_s20  ;;  %s1729_s29 = scalar_lea.hbm %s1845_s5, %s1654_s17 }
 0x246   : > { %s917_s24 = sshll.u32 %s313_s9, 4  ;;  %s1742_s7 = scalar_lea.vmem [#allocation10], %s1651_s20  ;;  %s1731_s24 = int_to_ptr.vmem [resolvable:$true] %s917_s24 }
 0x247   : > { %v720_v10 = vpop.permute.xlu1 %719  ;;  %s934_s11 = sshll.u32 %s1742_s7, 4  ;;  %s1747_s14 = scalar_lea.sflag [#allocation9], %s880_s18  ;;  %s1781_s11 = int_to_ptr.vmem [resolvable:$true] %s934_s11 }
 0x248   : > { %s1321_s15 = scalar_lea.vmem %s1731_s24, 256  ;;  %s1452_s12 = smov [#allocation8]  }
 0x249   : > { %p1322_p8 = scmp.ne.s32.totalorder %s1731_s24, %s1321_s15  ;;  %s1325_s8 = sshll.u32 %s1452_s12, 4  ;;  %s1326_s8 = int_to_ptr.vmem [resolvable:$false] %s1325_s8 }
 0x24a   : > { %s1327_s13 = scalar_lea.vmem %s1326_s8, 512  ;;  %p1328_p5 = scmp.lt.s32.totalorder %s1731_s24, %s1326_s8 }
 0x24b   : > { %p1323_p12 = pnand %p1322_p8, %p1574_p0  ;;  %p1329_p7 = scmp.lt.s32.totalorder %s1327_s13, %s1321_s15 }
 0x24d   : > { %p1324_p3 = pneg %p1323_p12  ;;  %p1330_p2 = por %p1329_p7, %p1328_p5 }
 0x24f   : > { %p1331_p6 = pnand %p1330_p2, %p1324_p3 }
 0x290   : > { %v566_v11 = vpop.permute.xlu1 %565  ;;  %v722_v12 = vpop.permute.xlu0 %721 }
 0x294   : > { %v568_v13 = vpop.permute.xlu1 %567  ;;  %v726_v17 = vpop.permute.xlu0 %725 }
 0x295   : > { %v575_v14 = vcombine.low %v564_v9, %v568_v13  ;;  %v576_v15 = vcombine.high %v564_v9, %v568_v13  ;;  %v747_v24 = vcombine.low %v722_v12, %v726_v17  ;;  %v748_v25 = vcombine.high %v722_v12, %v726_v17 }
 0x297   : > { %v583_v20 = vrot.slane %v575_v14, %v1626_v30  ;;  %v590_v21 = vrot.slane %v576_v15, %v1626_v30  ;;  %v755_v39 = vrot.slane %v747_v24, %v1626_v30  ;;  %v762_v40 = vrot.slane %v748_v25, %v1626_v30 }
 0x298   : > { %v570_v16 = vpop.permute.xlu1 %569 }
 0x299   : > { %v591_v18 = vcombine.low %v566_v11, %v570_v16  ;;  %v592_v19 = vcombine.high %v566_v11, %v570_v16 }
 0x29b   : > { %v599_v22 = vrot.slane %v591_v18, %v1626_v30  ;;  %v606_v23 = vrot.slane %v592_v19, %v1626_v30 }
 0x29c   : > { %v724_v26 = vpop.permute.xlu1 %723 }
 0x29d   : > { %v607_v27 = vcombine.low %v583_v20, %v599_v22  ;;  %v608_v28 = vcombine.high %v583_v20, %v599_v22  ;;  %v623_v29 = vcombine.low %v590_v21, %v606_v23  ;;  %v624_v31 = vcombine.high %v590_v21, %v606_v23 }
 0x29e   : > { %v731_v32 = vcombine.low %v720_v10, %v724_v26  ;;  %v732_v33 = vcombine.high %v720_v10, %v724_v26 }
 0x29f   : > { %v615_v34 = vrot.slane %v607_v27, %v1630_v36  ;;  %v622_v35 = vrot.slane %v608_v28, %v1630_v36  ;;  %v631_v37 = vrot.slane %v623_v29, %v1630_v36  ;;  %v638_v38 = vrot.slane %v624_v31, %v1630_v36 }
 0x2a0   : > { %v739_v41 = vrot.slane %v731_v32, %v1626_v30  ;;  %v746_v42 = vrot.slane %v732_v33, %v1626_v30 }
 0x2a1   : > { %v643_v43 = vcombine.low %v615_v34, %v622_v35  ;;  %v1113_v44 = vcombine.high %v615_v34, %v622_v35  ;;  %v659_v45 = vcombine.low %v631_v37, %v638_v38  ;;  %v1114_v46 = vcombine.high %v631_v37, %v638_v38 }
 0x2a2   : > { %v763_v47 = vcombine.low %v739_v41, %v755_v39  ;;  %v764_v48 = vcombine.high %v739_v41, %v755_v39  ;;  %v779_v49 = vcombine.low %v746_v42, %v762_v40  ;;  %v780_v50 = vcombine.high %v746_v42, %v762_v40 }
 0x2a3   : > { %v650_v51 = vrot.slane %v643_v43, %v1626_v30  ;;  %v658_v52 = vrot.slane %v1113_v44, %v1626_v30  ;;  %v666_v53 = vrot.slane %v659_v45, %v1626_v30  ;;  %v674_v54 = vrot.slane %v1114_v46, %v1626_v30 }
 0x2a4   : > { %v771_v55 = vrot.slane %v763_v47, %v1630_v36  ;;  %v778_v56 = vrot.slane %v764_v48, %v1630_v36  ;;  %v787_v57 = vrot.slane %v779_v49, %v1630_v36  ;;  %v794_v58 = vrot.slane %v780_v50, %v1630_v36 }
 0x2a5   : > { %v675_v59 = vcombine.low %v650_v51, %v658_v52  ;;  %v676_v60 = vcombine.high %v650_v51, %v658_v52  ;;  %v691_v61 = vcombine.low %v666_v53, %v674_v54  ;;  %v692_v62 = vcombine.high %v666_v53, %v674_v54 }
 0x2a6   : > { %v799_v63 = vcombine.low %v771_v55, %v778_v56  ;;  %v1115_v0 = vcombine.high %v771_v55, %v778_v56  ;;  %v815_v1 = vcombine.low %v787_v57, %v794_v58  ;;  %v1116_v2 = vcombine.high %v787_v57, %v794_v58 }
 0x2a7   : > { %v683_v3 = vrot.slane %v675_v59, %v1630_v36  ;;  %v690_v4 = vrot.slane %v676_v60, %v1630_v36  ;;  %v699_v5 = vrot.slane %v691_v61, %v1630_v36  ;;  %v706_v6 = vrot.slane %v692_v62, %v1630_v36 }
 0x2a8   : > { %v806_v7 = vrot.slane %v799_v63, %v1626_v30  ;;  %v814_v8 = vrot.slane %v1115_v0, %v1626_v30  ;;  %v822_v9 = vrot.slane %v815_v1, %v1626_v30  ;;  %v830_v10 = vrot.slane %v1116_v2, %v1626_v30 }
 0x2a9   : > { %v707_v11 = vcombine.low %v683_v3, %v699_v5  ;;  %v708_v12 = vcombine.high %v683_v3, %v699_v5  ;;  %v709_v13 = vcombine.low %v690_v4, %v706_v6  ;;  %v710_v14 = vcombine.high %v690_v4, %v706_v6 }
 0x2aa   : > { %v831_v15 = vcombine.low %v806_v7, %v814_v8  ;;  %v832_v16 = vcombine.high %v806_v7, %v814_v8  ;;  %v847_v17 = vcombine.low %v822_v9, %v830_v10  ;;  %v848_v18 = vcombine.high %v822_v9, %v830_v10 }
 0x2ab   : > { %v711_v19 = vpack.c.bf16 %v707_v11, %v707_v11  ;;  %v712_v20 = vpack.c.bf16 %v708_v12, %v708_v12  ;;  %v713_v21 = vpack.c.bf16 %v709_v13, %v709_v13  ;;  %v714_v22 = vpack.c.bf16 %v710_v14, %v710_v14 }
 0x2ac   : > { %v839_v30 = vrot.slane %v831_v15, %v1630_v36  ;;  %v846_v23 = vrot.slane %v832_v16, %v1630_v36  ;;  %v855_v24 = vrot.slane %v847_v17, %v1630_v36  ;;  %v862_v25 = vrot.slane %v848_v18, %v1630_v36 }
 0x2ad   : > { %715 = vst.msk [vmem:[%s313_s9] sm:$0xf] %vm558_vm2, %v711_v19  ;;  %716 = vst.msk [vmem:[%s313_s9 + $0x4] sm:$0xf] %vm558_vm2, %v712_v20 }
 0x2ae   : > { %717 = vst.msk [vmem:[%s313_s9 + $0x8] sm:$0xf] %vm558_vm2, %v713_v21  ;;  %718 = vst.msk [vmem:[%s313_s9 + $0xc] sm:$0xf] %vm558_vm2, %v714_v22  ;;  %v863_v26 = vcombine.low %v839_v30, %v855_v24  ;;  %v864_v27 = vcombine.high %v839_v30, %v855_v24  ;;  %v865_v28 = vcombine.low %v846_v23, %v862_v25 }
 0x2af   : > { %v866_v29 = vcombine.high %v846_v23, %v862_v25 }
 0x2b0   : > { %1334 = shalt.err (!%p1331_p6)
}
 0x2b1   : > { %s1335_s27 = scalar_lea.hbm %s1729_s29, 256  ;;  %s1339_s9 = scalar_lea.hbm %s1845_s5, 512 }
 0x2b2   : > { %p1336_p9 = scmp.ne.s32.totalorder %s1729_s29, %s1335_s27  ;;  %p1340_p1 = scmp.lt.s32.totalorder %s1729_s29, %s1845_s5 }
 0x2b3   : > { %p1341_p10 = scmp.lt.s32.totalorder %s1339_s9, %s1335_s27 }
 0x2b4   : > { %p1337_p13 = pnand %p1336_p9, %p1574_p0 }
 0x2b5   : > { %p1342_p4 = por %p1341_p10, %p1340_p1 }
 0x2b6   : > { %p1338_p11 = pneg %p1337_p13 }
 0x2b8   : > { %p1343_p8 = pnand %p1342_p4, %p1338_p11 }
 0x2ba   : > { %1346 = shalt.err (!%p1343_p8)
}
 0x2bb   : > { %1149 = dma.vmem_to_hbm [thread:$0]  (%p1574_p0), %s1731_s24, 256, %s1729_s29, %s1747_s14, %s1447_s16, %s1447_s16, %s1451_s25   ;;  %v867_v36 = vpack.c.bf16 %v863_v26, %v863_v26  ;;  %v868_v31 = vpack.c.bf16 %v864_v27, %v864_v27  ;;  %v869_v32 = vpack.c.bf16 %v865_v28, %v865_v28  ;;  %v870_v33 = vpack.c.bf16 %v866_v29, %v866_v29 }
 0x2bc   : > { %s1777_s8 = scalar_lea.hbm %s1846_s6, %s1654_s17  ;;  %s1347_s24 = scalar_lea.vmem %s1781_s11, 256 }
 0x2bd   : > { %871 = vst.msk [vmem:[%s1742_s7] sm:$0xf] %vm558_vm2, %v867_v36  ;;  %872 = vst.msk [vmem:[%s1742_s7 + $0x4] sm:$0xf] %vm558_vm2, %v868_v31  ;;  %p1348_p12 = scmp.ne.s32.totalorder %s1781_s11, %s1347_s24  ;;  %s1453_s17 = smov [#allocation10]  }
 0x2be   : > { %873 = vst.msk [vmem:[%s1742_s7 + $0x8] sm:$0xf] %vm558_vm2, %v869_v32  ;;  %874 = vst.msk [vmem:[%s1742_s7 + $0xc] sm:$0xf] %vm558_vm2, %v870_v33  ;;  %s1351_s29 = sshll.u32 %s1453_s17, 4  ;;  %s1352_s29 = int_to_ptr.vmem [resolvable:$false] %s1351_s29 }
 0x2bf   : > { %p1349_p3 = pnand %p1348_p12, %p1574_p0  ;;  %s1353_s13 = scalar_lea.vmem %s1352_s29, 512 }
 0x2c0   : > { %p1354_p7 = scmp.lt.s32.totalorder %s1781_s11, %s1352_s29  ;;  %p1355_p2 = scmp.lt.s32.totalorder %s1353_s13, %s1347_s24 }
 0x2c1   : > { %p1350_p5 = pneg %p1349_p3 }
 0x2c2   : > { %p1356_p6 = por %p1355_p2, %p1354_p7 }
 0x2c4   : > { %p1357_p9 = pnand %p1356_p6, %p1350_p5 }
 0x2c6   : > { %1360 = shalt.err (!%p1357_p9)
}
 0x2c7   : > { %s1361_s27 = scalar_lea.hbm %s1777_s8, 256  ;;  %s1365_s18 = scalar_lea.hbm %s1846_s6, 512 }
 0x2c8   : > { %p1362_p13 = scmp.ne.s32.totalorder %s1777_s8, %s1361_s27  ;;  %p1366_p10 = scmp.lt.s32.totalorder %s1777_s8, %s1846_s6 }
 0x2c9   : > { %p1367_p4 = scmp.lt.s32.totalorder %s1365_s18, %s1361_s27 }
 0x2ca   : > { %p1363_p11 = pnand %p1362_p13, %p1574_p0 }
 0x2cb   : > { %p1368_p8 = por %p1367_p4, %p1366_p10 }
 0x2cc   : > { %p1364_p1 = pneg %p1363_p11 }
 0x2ce   : > { %p1369_p12 = pnand %p1368_p8, %p1364_p1 }
 0x2d0   : > { %1372 = shalt.err (!%p1369_p12)
}
 0x2d1   : > { %1150 = dma.vmem_to_hbm [thread:$0]  (%p1574_p0), %s1781_s11, 256, %s1777_s8, %s1747_s14, %s1447_s16, %s1447_s16, %s1451_s25  }
 0x2d2 PF: > { %s949_s28 = sand.u32 1, %s1415_s21   ;;  %p1865_p3 = scmp.ne.s32.totalorder %s1854_s30, 0 }
 0x2d3   : > { %p1866_p5 = scmp.ge.s32.totalorder %s1435_s26, 2  ;;  %s950_s15 = scalar_lea.sflag [#allocation4], %s949_s28 }
 0x2d5   : > { %p1163_p7 = pnand %p1866_p5, %p1865_p3 }
 0x2d7   : > { %p1164_p2 = pneg %p1163_p7 }
 0x2d9   : > { %1406 = dma.done.wait (%p1164_p2), %s950_s15, 256  }
 0x2da   : > { %1408 = vsyncadd (%p1164_p2), %s950_s15, 4294967040  ;;  %s1867_s19 = sadd.s32 4294967294, %s1435_s26  }
 0x2db   : > { %s958_s12 = sand.u32 1, %s1867_s19  }
 0x2dc   : > { %s959_s24 = scalar_lea.sflag [#allocation9], %s958_s12 }
 0x2dd   : > { %1410 = dma.done.wait (%p1164_p2), %s959_s24, 512  }
 0x2de   : > { %1412 = vsyncadd (%p1164_p2), %s959_s24, 4294966784  ;;  %s27_s26 = sadd.s32 1, %s1435_s26   ;;  %s1868_s24 = sld [smem:[#allocation15_spill]] }
 0x2df   : > { %p24_p0 = scmp.ge.s32.totalorder %s27_s26, 4   ;;  %s1869_s25 = sld [smem:[#allocation16_spill]] }
 0x2e0   : > { %s1870_s21 = smov %s1419_s22  ;;  %s1871_s22 = smov %s1423_s23 }
 0x2e1   : > { %s1872_s23 = smov %s1583_s10  ;;  %26 = sbr.rel (!%p24_p0) target bundleno = 11 (0xb), region = 117 }
 0x2e6   :  { %973 = vsyncpa [#allocation3], 1 }
 0x2e7   :  { %975 = vsyncpa [#allocation3 + $0x1], 1 }
 0x2e8   :  { %976 = vsyncpa [#allocation6], 1 }
 0x2e9   :  { %977 = vsyncpa [#allocation4], 1 }
 0x2ea   :  { %979 = vsyncpa [#allocation4 + $0x1], 1 }
 0x2eb   :  { %980 = vsyncpa [#allocation9], 1 }
 0x2ec   :  { %982 = vsyncpa [#allocation9 + $0x1], 1 }

</bundles_post_ra>
